<compile_context>
chip_gen: v5e
topology: v5e:2x2
jax: 0.10.0
libtpu: 0.0.40
codegen_flags: <defaults>
</compile_context>

<pallas_src>
from functools import partial
from itertools import combinations

import numpy as np
import jax
import jax.numpy as jnp
from jax import lax
from jax.experimental import pallas as pl
from jax.experimental.pallas import tpu as pltpu


NUM_SHARDS = 2  # anchor shards -> grid steps; "parallel" lets v7x megacore split them


def _round_up(x, m):
    return ((x + m - 1) // m) * m


def _triplet_loss_kernel(labels_ref, nv_ref, e_ref, labc_ref, labr_ref,
                         out_ref, *, margin, n_pad, per_shard):
    """One grid step = one shard of anchors.

    labels_ref : SMEM (n_pad,)      int32  labels (zero padded)
    nv_ref     : SMEM (1,)          int32  number of valid rows (batch size)
    e_ref      : VMEM (n_pad,d_pad) f32    embeddings (zero padded)
    labc_ref   : VMEM (n_pad, 1)    int32  labels as a column (sublane orient.)
    labr_ref   : VMEM (1, n_pad)    int32  labels as a row (lane orient.)
    out_ref    : VMEM (1, 1, 128)   f32    this shard's partial hinge sum
    """
    shard = pl.program_id(0)
    n_valid = nv_ref[0]

    # ---- pairwise squared distances via the MXU (Gram-matrix trick) --------
    e = e_ref[...].astype(jnp.float32)                        # [N, D]
    g = lax.dot_general(e, e, (((1,), (1,)), ((), ())),       # E @ E.T -> MXU
                        preferred_element_type=jnp.float32)   # [N, N]
    row_i = lax.broadcasted_iota(jnp.int32, (n_pad, n_pad), 0)
    col_i = lax.broadcasted_iota(jnp.int32, (n_pad, n_pad), 1)
    diag = jnp.where(row_i == col_i, g, 0.0)
    sq_row = jnp.sum(diag, axis=0, keepdims=True)             # [1, N]  ||e_j||^2
    sq_col = jnp.sum(diag, axis=1, keepdims=True)             # [N, 1]  ||e_i||^2
    d2 = sq_col + sq_row - 2.0 * g                            # [N, N], lives in vregs

    # ---- loop-invariant masks / iotas (hoisted out of the anchor loop) -----
    lab_col = labc_ref[...]                                   # [N, 1]
    lab_row = labr_ref[...]                                   # [1, N]
    p_ids = lax.broadcasted_iota(jnp.int32, (n_pad, 1), 0)    # positive index
    n_ids = lax.broadcasted_iota(jnp.int32, (1, n_pad), 1)    # negative index
    p_in_batch = p_ids < n_valid                              # [N, 1]
    n_in_batch = n_ids < n_valid                              # [1, N]

    def anchor_body(i, acc):
        a = shard * per_shard + i                             # anchor index
        lab_a = labels_ref[a]                                 # scalar label (SMEM)
        # Anchor row of d2 in both orientations (d2 is symmetric): two masked
        # XLU reduces on the in-register matrix -- no dynamic slicing, no VMEM.
        r_row = jnp.sum(jnp.where(row_i == a, d2, 0.0),
                        axis=0, keepdims=True)                # [1, N]  d(a, n)
        r_col = jnp.sum(jnp.where(col_i == a, d2, 0.0),
                        axis=1, keepdims=True)                # [N, 1]  d(a, p)

        # AllTripletSelector masks: label[p]==label[a], p>a, label[n]!=label[a]
        pos = (lab_col == lab_a) & (p_ids > a) & p_in_batch   # [N, 1]
        neg = (lab_row != lab_a) & n_in_batch                 # [1, N]

        hinge = jnp.maximum(r_col - r_row + margin, 0.0)      # [N, N]
        return acc + jnp.sum(jnp.where(pos & neg, hinge, 0.0))

    partial_sum = lax.fori_loop(0, per_shard, anchor_body, jnp.float32(0.0),
                                unroll=(per_shard <= 16))
    out_ref[...] = jnp.full((1, 1, 128), partial_sum, dtype=jnp.float32)


def online_triplet_loss(embeddings: jax.Array, labels, margin: float):
    """AllTripletSelector online triplet loss.

    Returns (mean_loss as a f32 scalar, num_triplets as a Python int).
    """
    # TODO(synk): generic `triplet_selector` objects (arbitrary host Python)
    # have no Pallas equivalent; AllTripletSelector semantics are expressed
    # in-kernel via label/index masks, and only the triplet count (a Python
    # int return value in the original module) is computed on host.
    labels_np = np.asarray(labels).astype(np.int32)
    n = int(labels_np.shape[0])
    d = int(embeddings.shape[1])

    # Number of triplets (AllTripletSelector): sum over labels of C(k,2)*(n-k).
    _, counts = np.unique(labels_np, return_counts=True)
    num_triplets = int(np.sum((counts * (counts - 1)) // 2 * (n - counts)))
    assert num_triplets > 0, "no valid triplets for these labels"

    n_pad = max(8, _round_up(n, 8))        # sublane granularity (even -> shards divide)
    d_pad = max(128, _round_up(d, 128))    # lane-dense feature dim
    assert n_pad % NUM_SHARDS == 0
    per_shard = n_pad // NUM_SHARDS

    emb = jnp.asarray(embeddings, dtype=jnp.float32)
    emb = jnp.pad(emb, ((0, n_pad - n), (0, d_pad - d)))

    lab_pad = np.zeros((n_pad,), dtype=np.int32)
    lab_pad[:n] = labels_np
    labels_smem = jnp.asarray(lab_pad)                    # (n_pad,)
    nvalid = jnp.asarray([n], dtype=jnp.int32)            # (1,)
    lab_col = jnp.asarray(lab_pad.reshape(n_pad, 1))      # (n_pad, 1)
    lab_row = jnp.asarray(lab_pad.reshape(1, n_pad))      # (1, n_pad)

    kernel = partial(_triplet_loss_kernel, margin=float(margin),
                     n_pad=n_pad, per_shard=per_shard)

    partials = pl.pallas_call(
        kernel,
        out_shape=jax.ShapeDtypeStruct((NUM_SHARDS, 1, 128), jnp.float32),
        grid=(NUM_SHARDS,),
        in_specs=[
            pl.BlockSpec(memory_space=pltpu.MemorySpace.SMEM),   # labels
            pl.BlockSpec(memory_space=pltpu.MemorySpace.SMEM),   # n_valid
            pl.BlockSpec((n_pad, d_pad), lambda s: (0, 0)),      # embeddings (resident)
            pl.BlockSpec((n_pad, 1), lambda s: (0, 0)),          # labels, column
            pl.BlockSpec((1, n_pad), lambda s: (0, 0)),          # labels, row
        ],
        out_specs=pl.BlockSpec((1, 1, 128), lambda s: (s, 0, 0)),
        compiler_params=pltpu.CompilerParams(
            dimension_semantics=("parallel",)),
    )(labels_smem, nvalid, emb, lab_col, lab_row)

    loss = jnp.sum(partials[:, 0, 0]) / jnp.float32(num_triplets)
    return loss, num_triplets


# ---------------------------------------------------------------------------
# Reference (mirrors the PyTorch module with AllTripletSelector), in float64.
# ---------------------------------------------------------------------------
def _all_triplets(labels):
    labels = np.asarray(labels)
    triplets = []
    for label in sorted(set(labels.tolist())):
        mask = labels == label
        idx = np.where(mask)[0]
        if len(idx) < 2:
            continue
        neg = np.where(~mask)[0]
        for a, p in combinations(idx, 2):
            for nn in neg:
                triplets.append([a, p, nn])
    return np.asarray(triplets, dtype=np.int64)


def _reference(embeddings, labels, margin):
    trip = _all_triplets(labels)
    e = np.asarray(embeddings, dtype=np.float64)
    a, p, nn = e[trip[:, 0]], e[trip[:, 1]], e[trip[:, 2]]
    ap = ((a - p) ** 2).sum(1)
    an = ((a - nn) ** 2).sum(1)
    losses = np.maximum(ap - an + margin, 0.0)
    return losses.mean(), len(trip)


if __name__ == "__main__":
    key = jax.random.PRNGKey(0)
    N, D = 8, 32                       # batch of 8 embeddings, 32-d features
    margin = 1.0
    labels = np.array([0, 0, 0, 0, 1, 1, 1, 1], dtype=np.int32)

    embeddings = jax.random.normal(key, (N, D), dtype=jnp.float32)

    loss, n_triplets = online_triplet_loss(embeddings, labels, margin)
    loss = jax.block_until_ready(loss)

    ref_loss, ref_n = _reference(np.asarray(embeddings), labels, margin)
    assert n_triplets == ref_n, (n_triplets, ref_n)
    # f32 Gram-matrix distance formulation vs f64 direct-diff reference.
    assert np.allclose(np.asarray(loss), ref_loss, rtol=1e-4, atol=1e-4), (
        f"mismatch: {float(loss)} vs {ref_loss}")

    print("KERNEL_OK")
</pallas_src>

<mosaic_0001>
module attributes {stable_mosaic.version = 11 : i64} {
  func.func @_triplet_loss_kernel(%arg0: i32, %arg1: memref<8xi32, #tpu.memory_space<smem>>, %arg2: memref<1xi32, #tpu.memory_space<smem>>, %arg3: memref<8x128xf32, #tpu.memory_space<vmem>>, %arg4: memref<8x1xi32, #tpu.memory_space<vmem>>, %arg5: memref<1x8xi32, #tpu.memory_space<vmem>>, %arg6: memref<1x1x128xf32, #tpu.memory_space<vmem>>) attributes {dimension_semantics = [#tpu.dimension_semantics<parallel>], iteration_bounds = array<i64: 2>, scalar_prefetch = 0 : i64, scratch_operands = 0 : i64, tpu.core_type = #tpu.core_type<tc>, window_params = [{transform_indices = @transform_0, window_bounds = array<i64: 8>}, {transform_indices = @transform_1, window_bounds = array<i64: 1>}, {pipeline_mode = #tpu.pipeline_mode<synchronous>, transform_indices = @transform_2, window_bounds = array<i64: 8, 128>}, {pipeline_mode = #tpu.pipeline_mode<synchronous>, transform_indices = @transform_3, window_bounds = array<i64: 8, 1>}, {pipeline_mode = #tpu.pipeline_mode<synchronous>, transform_indices = @transform_4, window_bounds = array<i64: 1, 8>}, {transform_indices = @transform_5, window_bounds = array<i64: 1, 1, 128>}]} {
    %c0 = arith.constant 0 : index
    %0 = memref.load %arg2[%c0] : memref<1xi32, #tpu.memory_space<smem>>
    %c0_0 = arith.constant 0 : index
    %c0_1 = arith.constant 0 : index
    %1 = vector.load %arg3[%c0_0, %c0_1] : memref<8x128xf32, #tpu.memory_space<vmem>>, vector<8x128xf32>
    %cst = arith.constant dense<0.000000e+00> : vector<8x8xf32>
    %2 = tpu.matmul %1, %1, %cst {dimension_numbers = #tpu.dot_dimension_numbers<[1], [1], [0], [0], [0, 0, 1, 0], [], []>} : vector<8x128xf32>, vector<8x128xf32>, vector<8x8xf32> -> vector<8x8xf32>
    %3 = tpu.iota {dimensions = array<i32: 0>} : vector<8x8xi32>
    %4 = tpu.iota {dimensions = array<i32: 1>} : vector<8x8xi32>
    %5 = arith.cmpi eq, %3, %4 : vector<8x8xi32>
    %cst_2 = arith.constant 0.000000e+00 : f32
    %6 = vector.broadcast %cst_2 : f32 to vector<8x8xf32>
    %7 = arith.select %5, %2, %6 : vector<8x8xi1>, vector<8x8xf32>
    %cst_3 = arith.constant dense<0.000000e+00> : vector<8xf32>
    %8 = vector.multi_reduction <add>, %7, %cst_3 [0] : vector<8x8xf32> to vector<8xf32>
    %9 = vector.shape_cast %8 : vector<8xf32> to vector<1x8xf32>
    %cst_4 = arith.constant dense<0.000000e+00> : vector<8xf32>
    %10 = vector.multi_reduction <add>, %7, %cst_4 [1] : vector<8x8xf32> to vector<8xf32>
    %11 = vector.shape_cast %10 : vector<8xf32> to vector<8x1xf32>
    %12 = vector.broadcast %11 : vector<8x1xf32> to vector<8x8xf32>
    %13 = vector.broadcast %9 : vector<1x8xf32> to vector<8x8xf32>
    %14 = arith.addf %12, %13 : vector<8x8xf32>
    %cst_5 = arith.constant 2.000000e+00 : f32
    %15 = vector.broadcast %cst_5 : f32 to vector<8x8xf32>
    %16 = arith.mulf %15, %2 : vector<8x8xf32>
    %17 = arith.subf %14, %16 : vector<8x8xf32>
    %c0_6 = arith.constant 0 : index
    %c0_7 = arith.constant 0 : index
    %18 = vector.load %arg4[%c0_6, %c0_7] : memref<8x1xi32, #tpu.memory_space<vmem>>, vector<8x1xi32>
    %c0_8 = arith.constant 0 : index
    %c0_9 = arith.constant 0 : index
    %19 = vector.load %arg5[%c0_8, %c0_9] : memref<1x8xi32, #tpu.memory_space<vmem>>, vector<1x8xi32>
    %20 = tpu.iota {dimensions = array<i32: 0>} : vector<8x1xi32>
    %21 = tpu.iota {dimensions = array<i32: 1>} : vector<1x8xi32>
    %22 = vector.broadcast %0 : i32 to vector<8x1xi32>
    %23 = arith.cmpi slt, %20, %22 : vector<8x1xi32>
    %24 = vector.broadcast %0 : i32 to vector<1x8xi32>
    %25 = arith.cmpi slt, %21, %24 : vector<1x8xi32>
    %cst_10 = arith.constant 0.000000e+00 : f32
    %c0_i32 = arith.constant 0 : i32
    %c4_i32 = arith.constant 4 : i32
    %26 = arith.muli %arg0, %c4_i32 : i32
    %27 = arith.addi %26, %c0_i32 : i32
    %28 = arith.index_cast %27 : i32 to index
    %29 = memref.load %arg1[%28] : memref<8xi32, #tpu.memory_space<smem>>
    %30 = vector.broadcast %27 : i32 to vector<8x8xi32>
    %31 = arith.cmpi eq, %3, %30 : vector<8x8xi32>
    %cst_11 = arith.constant 0.000000e+00 : f32
    %32 = vector.broadcast %cst_11 : f32 to vector<8x8xf32>
    %33 = arith.select %31, %17, %32 : vector<8x8xi1>, vector<8x8xf32>
    %cst_12 = arith.constant dense<0.000000e+00> : vector<8xf32>
    %34 = vector.multi_reduction <add>, %33, %cst_12 [0] : vector<8x8xf32> to vector<8xf32>
    %35 = vector.shape_cast %34 : vector<8xf32> to vector<1x8xf32>
    %36 = vector.broadcast %27 : i32 to vector<8x8xi32>
    %37 = arith.cmpi eq, %4, %36 : vector<8x8xi32>
    %cst_13 = arith.constant 0.000000e+00 : f32
    %38 = vector.broadcast %cst_13 : f32 to vector<8x8xf32>
    %39 = arith.select %37, %17, %38 : vector<8x8xi1>, vector<8x8xf32>
    %cst_14 = arith.constant dense<0.000000e+00> : vector<8xf32>
    %40 = vector.multi_reduction <add>, %39, %cst_14 [1] : vector<8x8xf32> to vector<8xf32>
    %41 = vector.shape_cast %40 : vector<8xf32> to vector<8x1xf32>
    %42 = vector.broadcast %29 : i32 to vector<8x1xi32>
    %43 = arith.cmpi eq, %18, %42 : vector<8x1xi32>
    %44 = vector.broadcast %27 : i32 to vector<8x1xi32>
    %45 = arith.cmpi sgt, %20, %44 : vector<8x1xi32>
    %46 = arith.andi %43, %45 : vector<8x1xi1>
    %47 = arith.andi %46, %23 : vector<8x1xi1>
    %48 = vector.broadcast %29 : i32 to vector<1x8xi32>
    %49 = arith.cmpi ne, %19, %48 : vector<1x8xi32>
    %50 = arith.andi %49, %25 : vector<1x8xi1>
    %51 = vector.broadcast %41 : vector<8x1xf32> to vector<8x8xf32>
    %52 = vector.broadcast %35 : vector<1x8xf32> to vector<8x8xf32>
    %53 = arith.subf %51, %52 : vector<8x8xf32>
    %cst_15 = arith.constant 1.000000e+00 : f32
    %54 = vector.broadcast %cst_15 : f32 to vector<8x8xf32>
    %55 = arith.addf %53, %54 : vector<8x8xf32>
    %cst_16 = arith.constant 0.000000e+00 : f32
    %56 = vector.broadcast %cst_16 : f32 to vector<8x8xf32>
    %57 = arith.maximumf %55, %56 : vector<8x8xf32>
    %58 = vector.broadcast %47 : vector<8x1xi1> to vector<8x8xi1>
    %59 = vector.broadcast %50 : vector<1x8xi1> to vector<8x8xi1>
    %60 = arith.andi %58, %59 : vector<8x8xi1>
    %cst_17 = arith.constant 0.000000e+00 : f32
    %61 = vector.broadcast %cst_17 : f32 to vector<8x8xf32>
    %62 = arith.select %60, %57, %61 : vector<8x8xi1>, vector<8x8xf32>
    %63 = vector.shape_cast %62 : vector<8x8xf32> to vector<1x8x8xf32>
    %cst_18 = arith.constant dense<0.000000e+00> : vector<1xf32>
    %64 = vector.multi_reduction <add>, %63, %cst_18 [1, 2] : vector<1x8x8xf32> to vector<1xf32>
    %65 = vector.shape_cast %64 : vector<1xf32> to vector<1x1x1xf32>
    %66 = vector.extract %65[0, 0, 0] : f32 from vector<1x1x1xf32>
    %67 = arith.addf %cst_10, %66 : f32
    %c1_i32 = arith.constant 1 : i32
    %c4_i32_19 = arith.constant 4 : i32
    %68 = arith.muli %arg0, %c4_i32_19 : i32
    %69 = arith.addi %68, %c1_i32 : i32
    %70 = arith.index_cast %69 : i32 to index
    %71 = memref.load %arg1[%70] : memref<8xi32, #tpu.memory_space<smem>>
    %72 = vector.broadcast %69 : i32 to vector<8x8xi32>
    %73 = arith.cmpi eq, %3, %72 : vector<8x8xi32>
    %cst_20 = arith.constant 0.000000e+00 : f32
    %74 = vector.broadcast %cst_20 : f32 to vector<8x8xf32>
    %75 = arith.select %73, %17, %74 : vector<8x8xi1>, vector<8x8xf32>
    %cst_21 = arith.constant dense<0.000000e+00> : vector<8xf32>
    %76 = vector.multi_reduction <add>, %75, %cst_21 [0] : vector<8x8xf32> to vector<8xf32>
    %77 = vector.shape_cast %76 : vector<8xf32> to vector<1x8xf32>
    %78 = vector.broadcast %69 : i32 to vector<8x8xi32>
    %79 = arith.cmpi eq, %4, %78 : vector<8x8xi32>
    %cst_22 = arith.constant 0.000000e+00 : f32
    %80 = vector.broadcast %cst_22 : f32 to vector<8x8xf32>
    %81 = arith.select %79, %17, %80 : vector<8x8xi1>, vector<8x8xf32>
    %cst_23 = arith.constant dense<0.000000e+00> : vector<8xf32>
    %82 = vector.multi_reduction <add>, %81, %cst_23 [1] : vector<8x8xf32> to vector<8xf32>
    %83 = vector.shape_cast %82 : vector<8xf32> to vector<8x1xf32>
    %84 = vector.broadcast %71 : i32 to vector<8x1xi32>
    %85 = arith.cmpi eq, %18, %84 : vector<8x1xi32>
    %86 = vector.broadcast %69 : i32 to vector<8x1xi32>
    %87 = arith.cmpi sgt, %20, %86 : vector<8x1xi32>
    %88 = arith.andi %85, %87 : vector<8x1xi1>
    %89 = arith.andi %88, %23 : vector<8x1xi1>
    %90 = vector.broadcast %71 : i32 to vector<1x8xi32>
    %91 = arith.cmpi ne, %19, %90 : vector<1x8xi32>
    %92 = arith.andi %91, %25 : vector<1x8xi1>
    %93 = vector.broadcast %83 : vector<8x1xf32> to vector<8x8xf32>
    %94 = vector.broadcast %77 : vector<1x8xf32> to vector<8x8xf32>
    %95 = arith.subf %93, %94 : vector<8x8xf32>
    %cst_24 = arith.constant 1.000000e+00 : f32
    %96 = vector.broadcast %cst_24 : f32 to vector<8x8xf32>
    %97 = arith.addf %95, %96 : vector<8x8xf32>
    %cst_25 = arith.constant 0.000000e+00 : f32
    %98 = vector.broadcast %cst_25 : f32 to vector<8x8xf32>
    %99 = arith.maximumf %97, %98 : vector<8x8xf32>
    %100 = vector.broadcast %89 : vector<8x1xi1> to vector<8x8xi1>
    %101 = vector.broadcast %92 : vector<1x8xi1> to vector<8x8xi1>
    %102 = arith.andi %100, %101 : vector<8x8xi1>
    %cst_26 = arith.constant 0.000000e+00 : f32
    %103 = vector.broadcast %cst_26 : f32 to vector<8x8xf32>
    %104 = arith.select %102, %99, %103 : vector<8x8xi1>, vector<8x8xf32>
    %105 = vector.shape_cast %104 : vector<8x8xf32> to vector<1x8x8xf32>
    %cst_27 = arith.constant dense<0.000000e+00> : vector<1xf32>
    %106 = vector.multi_reduction <add>, %105, %cst_27 [1, 2] : vector<1x8x8xf32> to vector<1xf32>
    %107 = vector.shape_cast %106 : vector<1xf32> to vector<1x1x1xf32>
    %108 = vector.extract %107[0, 0, 0] : f32 from vector<1x1x1xf32>
    %109 = arith.addf %67, %108 : f32
    %c2_i32 = arith.constant 2 : i32
    %c4_i32_28 = arith.constant 4 : i32
    %110 = arith.muli %arg0, %c4_i32_28 : i32
    %111 = arith.addi %110, %c2_i32 : i32
    %112 = arith.index_cast %111 : i32 to index
    %113 = memref.load %arg1[%112] : memref<8xi32, #tpu.memory_space<smem>>
    %114 = vector.broadcast %111 : i32 to vector<8x8xi32>
    %115 = arith.cmpi eq, %3, %114 : vector<8x8xi32>
    %cst_29 = arith.constant 0.000000e+00 : f32
    %116 = vector.broadcast %cst_29 : f32 to vector<8x8xf32>
    %117 = arith.select %115, %17, %116 : vector<8x8xi1>, vector<8x8xf32>
    %cst_30 = arith.constant dense<0.000000e+00> : vector<8xf32>
    %118 = vector.multi_reduction <add>, %117, %cst_30 [0] : vector<8x8xf32> to vector<8xf32>
    %119 = vector.shape_cast %118 : vector<8xf32> to vector<1x8xf32>
    %120 = vector.broadcast %111 : i32 to vector<8x8xi32>
    %121 = arith.cmpi eq, %4, %120 : vector<8x8xi32>
    %cst_31 = arith.constant 0.000000e+00 : f32
    %122 = vector.broadcast %cst_31 : f32 to vector<8x8xf32>
    %123 = arith.select %121, %17, %122 : vector<8x8xi1>, vector<8x8xf32>
    %cst_32 = arith.constant dense<0.000000e+00> : vector<8xf32>
    %124 = vector.multi_reduction <add>, %123, %cst_32 [1] : vector<8x8xf32> to vector<8xf32>
    %125 = vector.shape_cast %124 : vector<8xf32> to vector<8x1xf32>
    %126 = vector.broadcast %113 : i32 to vector<8x1xi32>
    %127 = arith.cmpi eq, %18, %126 : vector<8x1xi32>
    %128 = vector.broadcast %111 : i32 to vector<8x1xi32>
    %129 = arith.cmpi sgt, %20, %128 : vector<8x1xi32>
    %130 = arith.andi %127, %129 : vector<8x1xi1>
    %131 = arith.andi %130, %23 : vector<8x1xi1>
    %132 = vector.broadcast %113 : i32 to vector<1x8xi32>
    %133 = arith.cmpi ne, %19, %132 : vector<1x8xi32>
    %134 = arith.andi %133, %25 : vector<1x8xi1>
    %135 = vector.broadcast %125 : vector<8x1xf32> to vector<8x8xf32>
    %136 = vector.broadcast %119 : vector<1x8xf32> to vector<8x8xf32>
    %137 = arith.subf %135, %136 : vector<8x8xf32>
    %cst_33 = arith.constant 1.000000e+00 : f32
    %138 = vector.broadcast %cst_33 : f32 to vector<8x8xf32>
    %139 = arith.addf %137, %138 : vector<8x8xf32>
    %cst_34 = arith.constant 0.000000e+00 : f32
    %140 = vector.broadcast %cst_34 : f32 to vector<8x8xf32>
    %141 = arith.maximumf %139, %140 : vector<8x8xf32>
    %142 = vector.broadcast %131 : vector<8x1xi1> to vector<8x8xi1>
    %143 = vector.broadcast %134 : vector<1x8xi1> to vector<8x8xi1>
    %144 = arith.andi %142, %143 : vector<8x8xi1>
    %cst_35 = arith.constant 0.000000e+00 : f32
    %145 = vector.broadcast %cst_35 : f32 to vector<8x8xf32>
    %146 = arith.select %144, %141, %145 : vector<8x8xi1>, vector<8x8xf32>
    %147 = vector.shape_cast %146 : vector<8x8xf32> to vector<1x8x8xf32>
    %cst_36 = arith.constant dense<0.000000e+00> : vector<1xf32>
    %148 = vector.multi_reduction <add>, %147, %cst_36 [1, 2] : vector<1x8x8xf32> to vector<1xf32>
    %149 = vector.shape_cast %148 : vector<1xf32> to vector<1x1x1xf32>
    %150 = vector.extract %149[0, 0, 0] : f32 from vector<1x1x1xf32>
    %151 = arith.addf %109, %150 : f32
    %c3_i32 = arith.constant 3 : i32
    %c4_i32_37 = arith.constant 4 : i32
    %152 = arith.muli %arg0, %c4_i32_37 : i32
    %153 = arith.addi %152, %c3_i32 : i32
    %154 = arith.index_cast %153 : i32 to index
    %155 = memref.load %arg1[%154] : memref<8xi32, #tpu.memory_space<smem>>
    %156 = vector.broadcast %153 : i32 to vector<8x8xi32>
    %157 = arith.cmpi eq, %3, %156 : vector<8x8xi32>
    %cst_38 = arith.constant 0.000000e+00 : f32
    %158 = vector.broadcast %cst_38 : f32 to vector<8x8xf32>
    %159 = arith.select %157, %17, %158 : vector<8x8xi1>, vector<8x8xf32>
    %cst_39 = arith.constant dense<0.000000e+00> : vector<8xf32>
    %160 = vector.multi_reduction <add>, %159, %cst_39 [0] : vector<8x8xf32> to vector<8xf32>
    %161 = vector.shape_cast %160 : vector<8xf32> to vector<1x8xf32>
    %162 = vector.broadcast %153 : i32 to vector<8x8xi32>
    %163 = arith.cmpi eq, %4, %162 : vector<8x8xi32>
    %cst_40 = arith.constant 0.000000e+00 : f32
    %164 = vector.broadcast %cst_40 : f32 to vector<8x8xf32>
    %165 = arith.select %163, %17, %164 : vector<8x8xi1>, vector<8x8xf32>
    %cst_41 = arith.constant dense<0.000000e+00> : vector<8xf32>
    %166 = vector.multi_reduction <add>, %165, %cst_41 [1] : vector<8x8xf32> to vector<8xf32>
    %167 = vector.shape_cast %166 : vector<8xf32> to vector<8x1xf32>
    %168 = vector.broadcast %155 : i32 to vector<8x1xi32>
    %169 = arith.cmpi eq, %18, %168 : vector<8x1xi32>
    %170 = vector.broadcast %153 : i32 to vector<8x1xi32>
    %171 = arith.cmpi sgt, %20, %170 : vector<8x1xi32>
    %172 = arith.andi %169, %171 : vector<8x1xi1>
    %173 = arith.andi %172, %23 : vector<8x1xi1>
    %174 = vector.broadcast %155 : i32 to vector<1x8xi32>
    %175 = arith.cmpi ne, %19, %174 : vector<1x8xi32>
    %176 = arith.andi %175, %25 : vector<1x8xi1>
    %177 = vector.broadcast %167 : vector<8x1xf32> to vector<8x8xf32>
    %178 = vector.broadcast %161 : vector<1x8xf32> to vector<8x8xf32>
    %179 = arith.subf %177, %178 : vector<8x8xf32>
    %cst_42 = arith.constant 1.000000e+00 : f32
    %180 = vector.broadcast %cst_42 : f32 to vector<8x8xf32>
    %181 = arith.addf %179, %180 : vector<8x8xf32>
    %cst_43 = arith.constant 0.000000e+00 : f32
    %182 = vector.broadcast %cst_43 : f32 to vector<8x8xf32>
    %183 = arith.maximumf %181, %182 : vector<8x8xf32>
    %184 = vector.broadcast %173 : vector<8x1xi1> to vector<8x8xi1>
    %185 = vector.broadcast %176 : vector<1x8xi1> to vector<8x8xi1>
    %186 = arith.andi %184, %185 : vector<8x8xi1>
    %cst_44 = arith.constant 0.000000e+00 : f32
    %187 = vector.broadcast %cst_44 : f32 to vector<8x8xf32>
    %188 = arith.select %186, %183, %187 : vector<8x8xi1>, vector<8x8xf32>
    %189 = vector.shape_cast %188 : vector<8x8xf32> to vector<1x8x8xf32>
    %cst_45 = arith.constant dense<0.000000e+00> : vector<1xf32>
    %190 = vector.multi_reduction <add>, %189, %cst_45 [1, 2] : vector<1x8x8xf32> to vector<1xf32>
    %191 = vector.shape_cast %190 : vector<1xf32> to vector<1x1x1xf32>
    %192 = vector.extract %191[0, 0, 0] : f32 from vector<1x1x1xf32>
    %193 = arith.addf %151, %192 : f32
    %c4_i32_46 = arith.constant 4 : i32
    %194 = vector.broadcast %193 : f32 to vector<1x1x128xf32>
    %c0_47 = arith.constant 0 : index
    %c0_48 = arith.constant 0 : index
    %c0_49 = arith.constant 0 : index
    %195 = vector.load %arg6[%c0_47, %c0_48, %c0_49] : memref<1x1x128xf32, #tpu.memory_space<vmem>>, vector<1x1x128xf32>
    tpu.vector_store %arg6[%c0_47, %c0_48, %c0_49], %194 {strides = array<i32>} : memref<1x1x128xf32, #tpu.memory_space<vmem>>, vector<1x1x128xf32>,
    return
  }
  func.func @transform_0(%arg0: i32) -> i32 {
    %c0_i32 = arith.constant 0 : i32
    %c0_i32_0 = arith.constant 0 : i32
    return %c0_i32 : i32
  }
  func.func @transform_1(%arg0: i32) -> i32 {
    %c0_i32 = arith.constant 0 : i32
    %c0_i32_0 = arith.constant 0 : i32
    return %c0_i32 : i32
  }
  func.func @transform_2(%arg0: i32) -> (i32, i32) {
    %c0_i32 = arith.constant 0 : i32
    %c0_i32_0 = arith.constant 0 : i32
    %c0_i32_1 = arith.constant 0 : i32
    return %c0_i32, %c0_i32_0 : i32, i32
  }
  func.func @transform_3(%arg0: i32) -> (i32, i32) {
    %c0_i32 = arith.constant 0 : i32
    %c0_i32_0 = arith.constant 0 : i32
    %c0_i32_1 = arith.constant 0 : i32
    return %c0_i32, %c0_i32_0 : i32, i32
  }
  func.func @transform_4(%arg0: i32) -> (i32, i32) {
    %c0_i32 = arith.constant 0 : i32
    %c0_i32_0 = arith.constant 0 : i32
    %c0_i32_1 = arith.constant 0 : i32
    return %c0_i32, %c0_i32_0 : i32, i32
  }
  func.func @transform_5(%arg0: i32) -> (i32, i32, i32) {
    %c0_i32 = arith.constant 0 : i32
    %c0_i32_0 = arith.constant 0 : i32
    %c0_i32_1 = arith.constant 0 : i32
    return %arg0, %c0_i32, %c0_i32_0 : i32, i32, i32
  }
}

</mosaic_0001>

<bundles_post_ra>
// kernel: tpu_custom_call.1
= control target key start
LH: loop header
LB: loop body
LE: loop exit
PB: predicated region body
PF: predicated region fallthrough
CT: control target
= control target key end

     0   :  { %s934_s0 = inlined_call_operand.vmem [shape: s32[8], index: 0, kind: input, shape index: {}]   ;;  %s935_s1 = inlined_call_operand.<no memory space> [shape: s32[1], index: 1, kind: input, shape index: {}]   ;;  %s936_s2 = inlined_call_operand.vmem [shape: f32[8,128], index: 2, kind: input, shape index: {}]   ;;  %s937_s3 = inlined_call_operand.vmem [shape: s32[8,1], index: 3, kind: input, shape index: {}]   ;;  %s938_s4 = inlined_call_operand.vmem [shape: s32[1,8], index: 4, kind: input, shape index: {}]   ;;  %s939_s5 = inlined_call_operand.hbm [shape: f32[2,1,128], index: 5, kind: output, shape index: {}]  }
   0x1   :  { %10 = sst [smem:[#allocation2]] %s935_s1 }
   0x2   :  { %11 = vsyncpa [#allocation5], 0 }
   0x3   :  { %12 = vsyncpa [#allocation4], 0 }
   0x4   :  { %14 = vsyncpa [#allocation4 + $0x1], 0  ;;  %s713_s20 = smov 0   ;;  %s715_s21 = smov 0  }
   0x5   :  { %s717_s22 = smov 0   ;;  %s719_s23 = smov 0  }
   0x6 LB: > { %s734_s1 = sadd.s32 4294967295, %s676_s23   ;;  %s525_s24 = sadd.s32 4294967294, %s676_s23   ;;  %s676_s23 = sphi %s719_s23, %s951_s23   ;;  %s672_s22 = sphi %s717_s22, %s950_s22   ;;  %s668_s21 = sphi %s715_s21, %s949_s21   ;;  %s664_s20 = sphi %s713_s20, %s948_s20  }
   0x7   : > { %s738_s25 = sadd.s32 1, %s676_s23   ;;  %s132_s26 = sadd.s32 1, %s672_s22 }
   0x8   : > { %s129_s27 = ssub.s32 %s676_s23, %s738_s25  ;;  %p142_p0 = scmp.ne.s32.totalorder %s672_s22, %s668_s21 }
   0x9   : > { %p130_p1 = scmp.eq.s32.totalorder %s129_s27, 0  ;;  %p143_p2 = scmp.eq.s32.totalorder %s734_s1, 1 }
   0xa   : > { %p148_p3 = scmp.ne.s32.totalorder %s668_s21, %s664_s20  ;;  %p149_p4 = scmp.eq.s32.totalorder %s525_s24, 1 }
   0xb   : > { %s749_s28 = scalar_select %p130_p1, %s672_s22, %s132_s26  }
   0xc   : > { %p751_p5 = por %p143_p2, %p142_p0  ;;  %p755_p6 = por %p149_p4, %p148_p3 }
   0xd   : > { %p526_p7 = scmp.ge.s32.totalorder %s676_s23, 1  ;;  %p156_p8 = scmp.lt.s32.totalorder %s676_s23, 3 }
   0xe   : > { %p555_p9 = scmp.eq.s32.totalorder %s734_s1, 0  ;;  %s168_s8 = sshll.u32 %s934_s0, 4  ;;  %s169_s8 = int_to_ptr.vmem [resolvable:$true] %s168_s8 }
   0xf   : > { %p157_p10 = pnand %p526_p7, %p156_p8  ;;  %s678_s9 = smov [#allocation3]  }
  0x11   : > { %p547_p11 = pneg %p157_p10  ;;  %193 = sbr.rel (%p157_p10) target bundleno = 617 (0x269), region = 40 }
  0x13   : > { %p548_p12 = pnand %p555_p9, %p547_p11 }
  0x15   : > { %550 = dma.vmem_to_smem (!%p548_p12), %s169_s8, 16, %s678_s9, [#allocation5]  }
  0x16   : > { %655 = dma.done.wait (%p555_p9), [#allocation5], 16  }
  0x17   : > { %657 = vsyncadd (%p555_p9), [#allocation5], 4294967280 }
  0x18   : > { %200 = sfence }
  0x19   : > { %v218_v0 = vld [vmem:[%s936_s2] sm:$0xff]  ;;  %s769_s12 = sshll.u32 %s734_s1, 2  ;;  %s771_s13 = sld [smem:[#allocation2]]  ;;  %v239_v1 = vlaneseq  ;;  %v679_v7 = vmov 0   ;;  %vm245_vm6 = vcmask 64512  }
  0x1a   : > { %234 = vmatpush.xpose.msra.mxu0 %v218_v0  ;;  %s774_s14 = sld [smem:[#allocation3 + %s769_s12]]  ;;  %v781_v3 = vld [vmem:[%s937_s3] sm:$0xff]  ;;  %v785_v5 = vstv %s769_s12  ;;  %592 = vset.pattern.permute.xlu2 %v679_v7  ;;  %s311_s17 = sadd.s32 1, %s769_s12 }
  0x1b   : > { %v776_v2 = vshrl.u32 %v239_v1, 7  ;;  %593 = vset.pattern.permute.xlu0 %v679_v7  ;;  %594 = vset.pattern.permute.xlu1 %v679_v7  ;;  %v806_v10 = vand.u32 127, %v239_v1  ;;  %s407_s18 = sadd.s32 3, %s769_s12  ;;  %s359_s19 = sadd.s32 2, %s769_s12  ;;  %v313_v20 = vstv %s311_s17  ;;  %v259_v51 = vld [vmem:[%s938_s4] sm:$0x1] }
  0x1c   : > { %v409_v21 = vstv %s407_s18  ;;  %v361_v23 = vstv %s359_s19  ;;  %s823_s24 = sld [smem:[#allocation3 + %s311_s17]]  ;;  %s215_s8 = sand.u32 1, %s668_s21  }
  0x1d   : > { %235 = vmatmul.f32.vlgmr.msra.gmra.mxu0 %v218_v0  ;;  %vm282_vm2 = vcmp.gt.s32.totalorder %v776_v2, %v785_v5  ;;  %vm243_vm5 = vcmp.eq.s32.totalorder %v776_v2, %v806_v10  ;;  %vm314_vm7 = vcmp.eq.s32.totalorder %v776_v2, %v313_v20  ;;  %vm323_vm8 = vcmp.eq.s32.totalorder %v806_v10, %v313_v20  ;;  %s829_s26 = sld [smem:[#allocation3 + %s407_s18]]  ;;  %s216_s16 = scalar_lea.vmem [#allocation6], %s215_s8 }
  0x1e   : > { %vm275_vm9 = vcmp.eq.s32.totalorder %v806_v10, %v785_v5  ;;  %vm410_vm10 = vcmp.eq.s32.totalorder %v776_v2, %v409_v21  ;;  %vm419_vm11 = vcmp.eq.s32.totalorder %v806_v10, %v409_v21  ;;  %vm362_vm12 = vcmp.eq.s32.totalorder %v776_v2, %v361_v23  ;;  %s839_s27 = sld [smem:[#allocation3 + %s359_s19]]  ;;  %s468_s17 = sshll.u32 %s216_s16, 4  ;;  %s469_s17 = int_to_ptr.vmem [resolvable:$true] %s468_s17 }
  0x1f   : > { %v260_v4 = vstv %s771_s13  ;;  %vm371_vm13 = vcmp.eq.s32.totalorder %v806_v10, %v361_v23  ;;  %vm330_vm15 = vcmp.gt.s32.totalorder %v776_v2, %v313_v20  ;;  %s466_s13 = scalar_lea.hbm %s939_s5, %s734_s1 }
  0x20   : > { %v280_v6 = vstv %s774_s14  ;;  %vm792_vm0 = vcmp.lt.s32.totalorder %v776_v2, %v260_v4  ;;  %s470_s19 = sshll.u32 %s466_s13, 4  ;;  %s471_s19 = int_to_ptr.hbm [resolvable:$true] %s470_s19 }
  0x21   : > { %vm281_vm1 = vcmp.eq.s32.totalorder %v781_v3, %v280_v6  ;;  %s624_s6 = sshra.s32 %s471_s19, 4  ;;  %s625_s6 = int_to_ptr.hbm [resolvable:$true] %s624_s6 }
  0x22   : > { %vm283_vm3 = vmand %vm281_vm1, %vm282_vm2  ;;  %v328_v37 = vstv %s823_s24  ;;  %s626_s7 = scalar_lea.hbm %s625_s6, 1  ;;  %p631_p2 = scmp.lt.s32.totalorder %s625_s6, %s939_s5 }
  0x23   : > { %vm284_vm4 = vmand %vm283_vm3, %vm792_vm0  ;;  %vm329_vm14 = vcmp.eq.s32.totalorder %v781_v3, %v328_v37  ;;  %v424_v39 = vstv %s829_s26  ;;  %vm426_vm3 = vcmp.gt.s32.totalorder %v776_v2, %v409_v21  ;;  %p627_p13 = scmp.ne.s32.totalorder %s625_s6, %s626_s7 }
  0x24   : > { %v290_v9 = vsel %vm284_vm4, 1, %v679_v7  ;;  %vm331_vm1 = vmand %vm329_vm14, %vm330_vm15  ;;  %vm425_vm2 = vcmp.eq.s32.totalorder %v781_v3, %v424_v39  ;;  %v376_v41 = vstv %s839_s27  ;;  %vm429_vm15 = vcmp.ne.s32.totalorder %v259_v51, %v424_v39  ;;  %s458_s27 = scalar_lea.sflag [#allocation4], %s215_s8 }
  0x25   : > { %292 = vperm.xlu2 %592, %v290_v9   ;;  %vm332_vm4 = vmand %vm331_vm1, %vm792_vm0  ;;  %p628_p0 = pnand %p627_p13, %p751_p5 }
  0x26   : > { %v338_v40 = vsel %vm332_vm4, 1, %v679_v7  ;;  %vm884_vm4 = vcmp.ne.s32.totalorder %v259_v51, %v328_v37 }
  0x27   : > { %p629_p1 = pneg %p628_p0 }
  0x7f   : > { %v293_v59 = vpop.permute.xlu2 %292 }
  0x9a   : > { %v236_v11 = vpop.f32.mrf.mxu0 }
  0x9b   : > { %v244_v12 = vsel %vm243_vm5, %v236_v11, 0.0  ;;  %v256_v24 = vmul.f32 2.0, %v236_v11  ;;  %vm427_vm5 = vmand %vm425_vm2, %vm426_vm3  ;;  %vm294_vm3 = vcmp.eq.s32.totalorder %v293_v59, 1 }
  0x9c   : > { %v246_v13 = vsel %vm245_vm6, %v244_v12, 0.0 }
  0x9d   : > { %253 = vadd.xlane.f32.xlu0 %v246_v13  ;;  %v247_v14 = vrot.slane %v246_v13, 4 }
  0x9f   : > { %v248_v15 = vadd.f32 %v247_v14, %v246_v13 }
  0xa1   : > { %v249_v16 = vrot.slane %v248_v15, 2 }
  0xa3   : > { %v250_v17 = vadd.f32 %v249_v16, %v248_v15 }
  0xa5   : > { %v251_v18 = vrot.slane %v250_v17, 1 }
  0xa7   : > { %v252_v19 = vadd.f32 %v251_v18, %v250_v17 }
 0x110   : > { %v254_v22 = vpop.xlane.xlu0 %253 }
 0x111   : > { %v255_v25 = vadd.f32 %v254_v22, %v252_v19 }
 0x113   : > { %v257_v26 = vsub.f32 %v255_v25, %v256_v24 }
 0x115   : > { %v324_v27 = vsel %vm323_vm8, %v257_v26, 0.0  ;;  %v315_v28 = vsel %vm314_vm7, %v257_v26, 0.0  ;;  %v276_v29 = vsel %vm275_vm9, %v257_v26, 0.0  ;;  %v411_v30 = vsel %vm410_vm10, %v257_v26, 0.0  ;;  %vm428_vm7 = vmand %vm427_vm5, %vm792_vm0 }
 0x116   : > { %v325_v31 = vsel %vm245_vm6, %v324_v27, 0.0  ;;  %v277_v32 = vsel %vm245_vm6, %v276_v29, 0.0  ;;  %v420_v33 = vsel %vm419_vm11, %v257_v26, 0.0  ;;  %v363_v34 = vsel %vm362_vm12, %v257_v26, 0.0 }
 0x117   : > { %326 = vadd.xlane.f32.xlu1 %v325_v31  ;;  %278 = vadd.xlane.f32.xlu0 %v277_v32  ;;  %v421_v35 = vsel %vm245_vm6, %v420_v33, 0.0  ;;  %v372_v36 = vsel %vm371_vm13, %v257_v26, 0.0  ;;  %vm377_vm8 = vcmp.eq.s32.totalorder %v781_v3, %v376_v41  ;;  %vm378_vm9 = vcmp.gt.s32.totalorder %v776_v2, %v361_v23 }
 0x118   : > { %422 = vadd.xlane.f32.xlu2 %v421_v35  ;;  %v373_v38 = vsel %vm245_vm6, %v372_v36, 0.0  ;;  %v434_v42 = vsel %vm428_vm7, 1, %v679_v7  ;;  %vm379_vm10 = vmand %vm377_vm8, %vm378_vm9  ;;  %vm266_vm12 = vcmp.eq.s32.totalorder %v776_v2, %v785_v5  ;;  %v412_v46 = vsel %vm245_vm6, %v411_v30, 0.0 }
 0x119   : > { %vm380_vm11 = vmand %vm379_vm10, %vm792_vm0  ;;  %v267_v44 = vsel %vm266_vm12, %v257_v26, 0.0  ;;  %v413_v48 = vrot.slane %v412_v46, 4  ;;  %v316_v52 = vsel %vm245_vm6, %v315_v28, 0.0  ;;  %vm869_vm0 = vcmp.lt.s32.totalorder %v806_v10, %v260_v4 }
 0x11a   : > { %v386_v43 = vsel %vm380_vm11, 1, %v679_v7  ;;  %v268_v45 = vsel %vm245_vm6, %v267_v44, 0.0  ;;  %vm285_vm13 = vcmp.ne.s32.totalorder %v259_v51, %v280_v6  ;;  %v317_v56 = vrot.slane %v316_v52, 4  ;;  %vm430_vm1 = vmand %vm429_vm15, %vm869_vm0 }
 0x11b   : > { %v269_v47 = vrot.slane %v268_v45, 4  ;;  %v414_v50 = vadd.f32 %v413_v48, %v412_v46  ;;  %vm286_vm14 = vmand %vm285_vm13, %vm869_vm0  ;;  %v364_v5 = vsel %vm245_vm6, %v363_v34, 0.0  ;;  %v439_v9 = vsel %vm430_vm1, 1, %v679_v7 }
 0x11c   : > { %v318_v60 = vadd.f32 %v317_v56, %v316_v52  ;;  %v295_v62 = vsel %vm286_vm14, 1, %v679_v7  ;;  %v365_v13 = vrot.slane %v364_v5, 4  ;;  %v440_v14 = vperm.slane %v439_v9, 0  ;;  %vm334_vm8 = vmand %vm884_vm4, %vm869_vm0 }
 0x11d   : > { %v270_v49 = vadd.f32 %v269_v47, %v268_v45  ;;  %v415_v54 = vrot.slane %v414_v50, 2  ;;  %v296_v1 = vperm.slane %v295_v62, 0  ;;  %v343_v27 = vsel %vm334_vm8, 1, %v679_v7 }
 0x11e   : > { %v319_v0 = vrot.slane %v318_v60, 2  ;;  %v366_v19 = vadd.f32 %v365_v13, %v364_v5  ;;  %vm441_vm7 = vcmp.eq.s32.totalorder %v440_v14, 1  ;;  %v344_v30 = vperm.slane %v343_v27, 0 }
 0x11f   : > { %374 = vadd.xlane.f32.xlu1 %v373_v38  ;;  %v271_v53 = vrot.slane %v270_v49, 2  ;;  %v416_v58 = vadd.f32 %v415_v54, %v414_v50  ;;  %vm297_vm2 = vcmp.eq.s32.totalorder %v296_v1, 1  ;;  %vm381_vm11 = vcmp.ne.s32.totalorder %v259_v51, %v376_v41 }
 0x120   : > { %v320_v10 = vadd.f32 %v319_v0, %v318_v60  ;;  %vm298_vm5 = vmand %vm294_vm3, %vm297_vm2  ;;  %v367_v26 = vrot.slane %v366_v19, 2  ;;  %vm345_vm12 = vcmp.eq.s32.totalorder %v344_v30, 1 }
 0x121   : > { %v272_v57 = vadd.f32 %v271_v53, %v270_v49  ;;  %v417_v63 = vrot.slane %v416_v58, 1  ;;  %vm382_vm14 = vmand %vm381_vm11, %vm869_vm0 }
 0x122   : > { %v321_v17 = vrot.slane %v320_v10, 1  ;;  %v368_v31 = vadd.f32 %v367_v26, %v366_v19 }
 0x123   : > { %v273_v61 = vrot.slane %v272_v57, 1  ;;  %v418_v4 = vadd.f32 %v417_v63, %v416_v58 }
 0x124   : > { %v322_v24 = vadd.f32 %v321_v17, %v320_v10  ;;  %v369_v34 = vrot.slane %v368_v31, 1 }
 0x125   : > { %v274_v2 = vadd.f32 %v273_v61, %v272_v57 }
 0x126   : > { %v370_v39 = vadd.f32 %v369_v34, %v368_v31 }
 0x12b   : > { %340 = vperm.xlu0 %593, %v338_v40  }
 0x130   : > { %436 = vperm.xlu2 %592, %v434_v42   ;;  %v391_v42 = vsel %vm382_vm14, 1, %v679_v7 }
 0x131   : > { %v392_v44 = vperm.slane %v391_v42, 0 }
 0x133   : > { %vm393_vm1 = vcmp.eq.s32.totalorder %v392_v44, 1 }
 0x138   : > { %388 = vperm.xlu1 %594, %v386_v43  }
 0x18a   : > { %v279_v3 = vpop.xlane.xlu0 %278  ;;  %v327_v22 = vpop.xlane.xlu1 %326 }
 0x18b   : > { %v287_v6 = vsub.f32 %v279_v3, %v274_v2  ;;  %v423_v8 = vpop.xlane.xlu2 %422  ;;  %v335_v28 = vsub.f32 %v327_v22, %v322_v24 }
 0x18c   : > { %v431_v11 = vsub.f32 %v423_v8, %v418_v4 }
 0x18d   : > { %v288_v12 = vadd.f32 1.0, %v287_v6  ;;  %v336_v32 = vadd.f32 1.0, %v335_v28 }
 0x18e   : > { %v432_v18 = vadd.f32 1.0, %v431_v11 }
 0x18f   : > { %v289_v15 = vmax.f32 %v288_v12, 0.0  ;;  %v337_v36 = vmax.f32 %v336_v32, 0.0 }
 0x190   : > { %v433_v25 = vmax.f32 %v432_v18, 0.0 }
 0x191   : > { %v299_v20 = vsel %vm298_vm5, %v289_v15, 0.0 }
 0x192   : > { %v300_v21 = vsel %vm245_vm6, %v299_v20, 0.0  ;;  %v375_v37 = vpop.xlane.xlu1 %374 }
 0x193   : > { %v437_v23 = vpop.permute.xlu2 %436  ;;  %301 = vadd.xlane.f32.xlu2 %v300_v21  ;;  %v383_v43 = vsub.f32 %v375_v37, %v370_v39 }
 0x194   : > { %vm438_vm9 = vcmp.eq.s32.totalorder %v437_v23, 1 }
 0x195   : > { %vm442_vm10 = vmand %vm438_vm9, %vm441_vm7  ;;  %v384_v41 = vadd.f32 1.0, %v383_v43 }
 0x196   : > { %v443_v29 = vsel %vm442_vm10, %v433_v25, 0.0 }
 0x197   : > { %v444_v33 = vsel %vm245_vm6, %v443_v29, 0.0  ;;  %v385_v46 = vmax.f32 %v384_v41, 0.0 }
 0x19b   : > { %445 = vadd.xlane.f32.xlu2 %v444_v33 }
 0x19d   : > { %v341_v35 = vpop.permute.xlu0 %340 }
 0x19e   : > { %vm342_vm13 = vcmp.eq.s32.totalorder %v341_v35, 1 }
 0x19f   : > { %vm346_vm15 = vmand %vm342_vm13, %vm345_vm12 }
 0x1a0   : > { %v347_v38 = vsel %vm346_vm15, %v337_v36, 0.0 }
 0x1a1   : > { %v348_v40 = vsel %vm245_vm6, %v347_v38, 0.0 }
 0x1a2   : > { %349 = vadd.xlane.f32.xlu1 %v348_v40 }
 0x1aa   : > { %v389_v45 = vpop.permute.xlu1 %388 }
 0x1ab   : > { %vm390_vm2 = vcmp.eq.s32.totalorder %v389_v45, 1 }
 0x1ac   : > { %vm394_vm3 = vmand %vm390_vm2, %vm393_vm1 }
 0x1ad   : > { %v395_v47 = vsel %vm394_vm3, %v385_v46, 0.0 }
 0x1ae   : > { %v396_v48 = vsel %vm245_vm6, %v395_v47, 0.0 }
 0x1af   : > { %397 = vadd.xlane.f32.xlu0 %v396_v48 }
 0x206   : > { %v302_v49 = vpop.xlane.xlu2 %301 }
 0x207   : > { %v303_v50 = vrot.slane %v302_v49, 4 }
 0x209   : > { %v304_v51 = vadd.f32 %v303_v50, %v302_v49 }
 0x20b   : > { %v305_v52 = vrot.slane %v304_v51, 2 }
 0x20d   : > { %v306_v53 = vadd.f32 %v305_v52, %v304_v51 }
 0x20e   : > { %v446_v57 = vpop.xlane.xlu2 %445 }
 0x20f   : > { %v307_v54 = vrot.slane %v306_v53, 1  ;;  %v447_v59 = vrot.slane %v446_v57, 4 }
 0x211   : > { %v308_v55 = vadd.f32 %v307_v54, %v306_v53  ;;  %v448_v62 = vadd.f32 %v447_v59, %v446_v57 }
 0x213   : > { %533 = vpush %v308_v55  ;;  %v449_v1 = vrot.slane %v448_v62, 2 }
 0x215   : > { %v350_v7 = vpop.xlane.xlu1 %349  ;;  %v450_v5 = vadd.f32 %v449_v1, %v448_v62 }
 0x216   : > { %v351_v56 = vrot.slane %v350_v7, 4 }
 0x217   : > { %v451_v9 = vrot.slane %v450_v5, 1 }
 0x218   : > { %v352_v58 = vadd.f32 %v351_v56, %v350_v7 }
 0x219   : > { %v452_v12 = vadd.f32 %v451_v9, %v450_v5 }
 0x21a   : > { %v353_v60 = vrot.slane %v352_v58, 2 }
 0x21c   : > { %v354_v61 = vadd.f32 %v353_v60, %v352_v58 }
 0x21e   : > { %v355_v63 = vrot.slane %v354_v61, 1 }
 0x220   : > { %v356_v0 = vadd.f32 %v355_v63, %v354_v61 }
 0x222   : > { %v398_v2 = vpop.xlane.xlu0 %397  ;;  %535 = vpush %v356_v0 }
 0x223   : > { %v399_v3 = vrot.slane %v398_v2, 4 }
 0x225   : > { %v400_v4 = vadd.f32 %v399_v3, %v398_v2 }
 0x227   : > { %v401_v6 = vrot.slane %v400_v4, 2 }
 0x229   : > { %v402_v8 = vadd.f32 %v401_v6, %v400_v4 }
 0x22b   : > { %v403_v10 = vrot.slane %v402_v8, 1 }
 0x22d   : > { %v404_v11 = vadd.f32 %v403_v10, %v402_v8 }
 0x22f   : > { %537 = vpush %v404_v11 }
 0x230   : > { %539 = vpush %v452_v12 }
 0x244   : > { %s534_s9 = spop %533 }
 0x253   : > { %s536_s10 = spop %535 }
 0x254   : > { %s358_s14 = sadd.f32 %s536_s10, %s534_s9  ;;  %s630_s10 = scalar_lea.hbm %s939_s5, 2 }
 0x255   : > { %p632_p3 = scmp.lt.s32.totalorder %s630_s10, %s626_s7 }
 0x257   : > { %p633_p4 = por %p632_p3, %p631_p2 }
 0x259   : > { %p634_p7 = pnand %p633_p4, %p629_p1 }
 0x260   : > { %s538_s15 = spop %537 }
 0x261   : > { %s406_s18 = sadd.f32 %s538_s15, %s358_s14  ;;  %s540_s24 = spop %539 }
 0x263   : > { %s454_s26 = sadd.f32 %s540_s24, %s406_s18 }
 0x265   : > { %v455_v13 = vstv %s454_s26 }
 0x266   : > { %456 = vst [vmem:[%s216_s16] sm:$0x1] %v455_v13 }
 0x267   : > { %637 = shalt.err (!%p634_p7)
}
 0x268   : > { %545 = dma.vmem_to_hbm [thread:$0]  (%p751_p5), %s469_s17, 16, %s471_s19, %s458_s27  }
 0x269 PF: > { %p557_p8 = scmp.ge.s32.totalorder %s676_s23, 2  ;;  %s482_s8 = sand.u32 1, %s664_s20  }
 0x26a   : > { %s483_s13 = scalar_lea.sflag [#allocation4], %s482_s8 }
 0x26b   : > { %p552_p9 = pnand %p557_p8, %p755_p6 }
 0x26d   : > { %p553_p10 = pneg %p552_p9 }
 0x26f   : > { %659 = dma.done.wait (%p553_p10), %s483_s13, 16  }
 0x270   : > { %661 = vsyncadd (%p553_p10), %s483_s13, 4294967280  ;;  %p17_p11 = scmp.ge.s32.totalorder %s738_s25, 4   ;;  %s948_s20 = smov %s668_s21 }
 0x271   : > { %s949_s21 = smov %s672_s22  ;;  %s950_s22 = smov %s749_s28 }
 0x272   : > { %s951_s23 = smov %s738_s25  ;;  %19 = sbr.rel (!%p17_p11) target bundleno = 6 (0x6), region = 77 }
 0x277   :  { %488 = vsyncpa [#allocation4], 1 }
 0x278   :  { %490 = vsyncpa [#allocation4 + $0x1], 1 }
 0x279   :  { %491 = vsyncpa [#allocation5], 1 }
 0x27a   :  { %493 = vsyncpa [#allocation5 + $0x1], 1 }

</bundles_post_ra>
